<compile_context>
chip_gen: v6e
topology: v6e:2x2x1
jax: 0.10.0
libtpu: 0.0.40
codegen_flags: <defaults>
</compile_context>

<pallas_src>
import functools
import math

import jax
import jax.numpy as jnp
from jax import lax
from jax.experimental import pallas as pl
from jax.experimental.pallas import tpu as pltpu


# Finite "masked" value: exp() underflows to exactly 0, never produces NaN.
_NEG_INF = -1e30


# ----------------------------------------------------------------------------
# Kernel 1: Q/K/V projection (one pass over x; Q pre-scaled by 1/sqrt(dk)).
# ----------------------------------------------------------------------------
def _qkv_proj_kernel(x_ref, wq_ref, bq_ref, wk_ref, bk_ref, wv_ref, bv_ref,
                     q_ref, k_ref, v_ref, *, scale):
    x = x_ref[0]                                                  # (tp, d)

    def proj(w_ref, b_ref):
        # MXU matmul in compute_dtype, f32 accumulation, f32 bias add.
        return jnp.dot(x, w_ref[...], preferred_element_type=jnp.float32) + b_ref[...]

    q_ref[0] = (proj(wq_ref, bq_ref) * scale).astype(q_ref.dtype)
    k_ref[0] = proj(wk_ref, bk_ref).astype(k_ref.dtype)
    v_ref[0] = proj(wv_ref, bv_ref).astype(v_ref.dtype)


# ----------------------------------------------------------------------------
# Kernel 2: flash attention with online softmax.
# ----------------------------------------------------------------------------
def _flash_attn_kernel(*refs, causal, tq, tk):
    if causal:
        q_ref, k_ref, v_ref, o_ref, m_sc, l_sc, acc_sc = refs
        mask_ref = None
    else:
        q_ref, k_ref, v_ref, mask_ref, o_ref, m_sc, l_sc, acc_sc = refs

    qi = pl.program_id(1)
    ki = pl.program_id(2)

    @pl.when(ki == 0)
    def _init():
        m_sc[...] = jnp.full(m_sc.shape, _NEG_INF, m_sc.dtype)
        l_sc[...] = jnp.zeros_like(l_sc)
        acc_sc[...] = jnp.zeros_like(acc_sc)

    def _tile_update():
        q = q_ref[0]                                              # (tq, dk), pre-scaled
        k = k_ref[0]                                              # (tk, dk)
        v = v_ref[0]                                              # (tk, dk)

        # scores = Q @ K^T via a contraction on dk (no explicit transpose).
        s = lax.dot_general(q, k, (((1,), (1,)), ((), ())),
                            preferred_element_type=jnp.float32)   # (tq, tk) f32

        if causal:
            # In-kernel causal mask: no HBM mask traffic at all.
            row = qi * tq + lax.broadcasted_iota(jnp.int32, (tq, tk), 0)
            col = ki * tk + lax.broadcasted_iota(jnp.int32, (tq, tk), 1)
            s = jnp.where(row >= col, s, _NEG_INF)
        else:
            s = s + mask_ref[...].astype(jnp.float32)

        # Online (flash) softmax update, running stats in f32.
        m_prev = m_sc[...]
        m_new = jnp.maximum(m_prev, jnp.max(s, axis=-1, keepdims=True))
        alpha = jnp.exp(m_prev - m_new)
        p = jnp.exp(s - m_new)
        l_sc[...] = alpha * l_sc[...] + jnp.sum(p, axis=-1, keepdims=True)
        acc_sc[...] = alpha * acc_sc[...] + jnp.dot(
            p.astype(v.dtype), v, preferred_element_type=jnp.float32)
        m_sc[...] = m_new

    if causal:
        # Skip kv tiles that lie entirely above the diagonal for this q tile
        # (~2x fewer inner iterations for the causal case).
        @pl.when(ki * tk <= qi * tq + (tq - 1))
        def _():
            _tile_update()
    else:
        _tile_update()

    @pl.when(ki == pl.num_programs(2) - 1)
    def _finalize():
        # Exact division (once per q tile; negligible cost, better parity).
        o_ref[0] = (acc_sc[...] / l_sc[...]).astype(o_ref.dtype)


# ----------------------------------------------------------------------------
# Helpers.
# ----------------------------------------------------------------------------
def _pick_tile(dim, target, align):
    """Largest multiple of `align` that divides `dim` and is <= target; falls
    back to the full dim (a full-extent block is always a legal BlockSpec)."""
    if dim <= target or dim % align != 0:
        return dim
    t = min(target, dim)
    t -= t % align
    while t >= align:
        if dim % t == 0:
            return t
        t -= align
    return dim


def _vmem_limit_bytes(pipelined_bytes, resident_bytes=0):
    """Scoped-VMEM budget: double-buffered pipelined tiles + resident scratch,
    plus headroom for compiler temporaries.  Capped below v7x's 64 MiB."""
    est = 2 * pipelined_bytes + resident_bytes
    est = int(est * 1.5) + (2 << 20)
    return min(max(est, 16 << 20), 48 << 20)


# ----------------------------------------------------------------------------
# Wrappers.
# ----------------------------------------------------------------------------
def _project_qkv(x, wq, bq, wk, bk, wv, bv, dk, scale, compute_dtype, tp):
    B, T, d = x.shape
    cs = jnp.dtype(compute_dtype).itemsize
    pipelined = (tp * d * cs            # x tile
                 + 3 * d * dk * cs      # weights
                 + 3 * dk * 4           # biases (f32)
                 + 3 * tp * dk * cs)    # q/k/v output tiles

    grid_spec = pltpu.PrefetchScalarGridSpec(
        num_scalar_prefetch=0,
        grid=(B, T // tp),
        in_specs=[
            pl.BlockSpec((1, tp, d), lambda b, i: (b, i, 0)),     # x tile
            pl.BlockSpec((d, dk), lambda b, i: (0, 0)),           # Wq
            pl.BlockSpec((1, dk), lambda b, i: (0, 0)),           # bq
            pl.BlockSpec((d, dk), lambda b, i: (0, 0)),           # Wk
            pl.BlockSpec((1, dk), lambda b, i: (0, 0)),           # bk
            pl.BlockSpec((d, dk), lambda b, i: (0, 0)),           # Wv
            pl.BlockSpec((1, dk), lambda b, i: (0, 0)),           # bv
        ],
        out_specs=[
            pl.BlockSpec((1, tp, dk), lambda b, i: (b, i, 0)),
            pl.BlockSpec((1, tp, dk), lambda b, i: (b, i, 0)),
            pl.BlockSpec((1, tp, dk), lambda b, i: (b, i, 0)),
        ],
    )

    out_sds = jax.ShapeDtypeStruct((B, T, dk), compute_dtype)
    return pl.pallas_call(
        functools.partial(_qkv_proj_kernel, scale=scale),
        out_shape=(out_sds, out_sds, out_sds),
        grid_spec=grid_spec,
        compiler_params=pltpu.CompilerParams(
            dimension_semantics=("parallel", "parallel"),
            vmem_limit_bytes=_vmem_limit_bytes(pipelined),
        ),
    )(x.astype(compute_dtype),
      wq.astype(compute_dtype), bq.astype(jnp.float32),
      wk.astype(compute_dtype), bk.astype(jnp.float32),
      wv.astype(compute_dtype), bv.astype(jnp.float32))


def _flash_attention(q, k, v, mask, causal, tq, tk, out_dtype):
    B, T, dk = q.shape
    nq, nk = T // tq, T // tk
    cs = q.dtype.itemsize
    pipelined = tq * dk * cs + 2 * tk * dk * cs + tq * dk * jnp.dtype(out_dtype).itemsize

    in_specs = [
        pl.BlockSpec((1, tq, dk), lambda b, qi, ki: (b, qi, 0)),  # Q tile
        pl.BlockSpec((1, tk, dk), lambda b, qi, ki: (b, ki, 0)),  # K tile
        pl.BlockSpec((1, tk, dk), lambda b, qi, ki: (b, ki, 0)),  # V tile
    ]
    args = [q, k, v]
    if not causal:
        in_specs.append(pl.BlockSpec((tq, tk), lambda b, qi, ki: (qi, ki)))
        args.append(mask)
        pipelined += tq * tk * mask.dtype.itemsize
    resident = tq * dk * 4 + 2 * tq * 4                           # acc + m + l (f32)

    grid_spec = pltpu.PrefetchScalarGridSpec(
        num_scalar_prefetch=0,
        grid=(B, nq, nk),
        in_specs=in_specs,
        out_specs=pl.BlockSpec((1, tq, dk), lambda b, qi, ki: (b, qi, 0)),
        scratch_shapes=[
            pltpu.VMEM((tq, 1), jnp.float32),    # running max
            pltpu.VMEM((tq, 1), jnp.float32),    # running sum
            pltpu.VMEM((tq, dk), jnp.float32),   # output accumulator
        ],
    )

    # NOTE: a pipeline_mode=pl.Buffered(3) on the K/V specs is a further knob
    # once the mask stream is gone; left at the default depth for portability.
    return pl.pallas_call(
        functools.partial(_flash_attn_kernel, causal=causal, tq=tq, tk=tk),
        out_shape=jax.ShapeDtypeStruct((B, T, dk), out_dtype),
        grid_spec=grid_spec,
        compiler_params=pltpu.CompilerParams(
            dimension_semantics=("parallel", "parallel", "arbitrary"),
            vmem_limit_bytes=_vmem_limit_bytes(pipelined, resident),
        ),
    )(*args)


def self_attention_pallas(x, wq, bq, wk, bk, wv, bv, mask, dk, *,
                          causal=False, compute_dtype=jnp.bfloat16,
                          tq_target=256, tk_target=512, tp_target=512):
    """Forward pass of the PyTorch `self_attention` module.

    causal=False: `mask` is an arbitrary additive (T, T) mask (module spec).
    causal=True : mask is generated in-kernel (no HBM mask stream); `mask`
                  may be None.
    """
    B, T, d = x.shape
    assert wq.shape == (d, dk) and wk.shape == (d, dk) and wv.shape == (d, dk)
    if not causal and mask is None:
        raise ValueError("mask is required when causal=False")

    scale = 1.0 / math.sqrt(dk)

    # Tile selection respecting the (8, 128) BlockSpec divisibility rules:
    # second-to-last dims need multiples of 8; the mask's last dim (tk) needs
    # a multiple of 128 (or the full extent) when a mask is streamed.
    tp = _pick_tile(T, tp_target, 8)
    tq = _pick_tile(T, tq_target, 8)
    tk = _pick_tile(T, tk_target, 8 if causal else 128)

    q, k, v = _project_qkv(x, wq, bq, wk, bk, wv, bv, dk, scale, compute_dtype, tp)

    mask_in = None
    if not causal:
        # Stream the mask in bf16 when running the bf16 path (halves mask DMA;
        # 0 / -1e9 entries remain effectively exact).  Keep f32 otherwise.
        if jnp.dtype(compute_dtype) == jnp.dtype(jnp.bfloat16):
            mask_in = mask.astype(jnp.bfloat16)
        else:
            mask_in = mask

    return _flash_attention(q, k, v, mask_in, causal, tq, tk, x.dtype)


def reference_self_attention(x, wq, bq, wk, bk, wv, bv, mask, dk):
    q = x @ wq + bq[0]
    k = x @ wk + bk[0]
    v = x @ wv + bv[0]
    scores = q @ jnp.swapaxes(k, -2, -1) / math.sqrt(dk) + mask
    p = jax.nn.softmax(scores, axis=-1)
    return p @ v


if __name__ == "__main__":
    B, T, d, dk = 2, 8, 32, 16

    key = jax.random.PRNGKey(0)
    kx, kqk, kbq, kkk, kbk, kvk, kbv = jax.random.split(key, 7)

    x = jax.random.normal(kx, (B, T, d), dtype=jnp.float32)

    # Deterministic "Linear"-style init: W ~ U(-1/sqrt(d), 1/sqrt(d)), stored (d, dk).
    bound = 1.0 / math.sqrt(d)
    wq = jax.random.uniform(kqk, (d, dk), jnp.float32, -bound, bound)
    bq = jax.random.uniform(kbq, (1, dk), jnp.float32, -bound, bound)
    wk = jax.random.uniform(kkk, (d, dk), jnp.float32, -bound, bound)
    bk = jax.random.uniform(kbk, (1, dk), jnp.float32, -bound, bound)
    wv = jax.random.uniform(kvk, (d, dk), jnp.float32, -bound, bound)
    bv = jax.random.uniform(kbv, (1, dk), jnp.float32, -bound, bound)

    # Causal additive mask (T, T), broadcast over batch like in PyTorch.
    mask = jnp.where(jnp.tril(jnp.ones((T, T), dtype=bool)), 0.0, -1e9).astype(jnp.float32)

    ref = reference_self_attention(x, wq, bq, wk, bk, wv, bv, mask, dk)

    # 1) General additive-mask path, f32 end to end (exact division in the
    #    finalize; remaining deviation comes from the TPU matmul precision
    #    defaults and online-softmax reassociation).
    out_f32 = self_attention_pallas(x, wq, bq, wk, bk, wv, bv, mask, dk,
                                    causal=False, compute_dtype=jnp.float32)
    out_f32 = jax.block_until_ready(out_f32)
    assert out_f32.shape == (B, T, dk)
    assert jnp.allclose(out_f32, ref, atol=2e-2, rtol=2e-2), "f32/mask path mismatch"

    # 2) Performance path: in-kernel causal mask (no mask HBM stream), kv-tile
    #    skipping, bf16 MXU operands with f32 accumulation.  Looser tolerance
    #    reflects the intentional bf16 operand cast.
    out_bf16 = self_attention_pallas(x, wq, bq, wk, bk, wv, bv, None, dk,
                                     causal=True, compute_dtype=jnp.bfloat16)
    out_bf16 = jax.block_until_ready(out_bf16)
    assert out_bf16.shape == (B, T, dk)
    assert jnp.allclose(out_bf16, ref, atol=3e-2, rtol=3e-2), "bf16/causal path mismatch"

    print("KERNEL_OK")
</pallas_src>

<mosaic_0001>
module attributes {stable_mosaic.version = 11 : i64} {
  func.func @_qkv_proj_kernel(%arg0: i32, %arg1: i32, %arg2: memref<1x8x32xf32, #tpu.memory_space<vmem>>, %arg3: memref<32x16xf32, #tpu.memory_space<vmem>>, %arg4: memref<1x16xf32, #tpu.memory_space<vmem>>, %arg5: memref<32x16xf32, #tpu.memory_space<vmem>>, %arg6: memref<1x16xf32, #tpu.memory_space<vmem>>, %arg7: memref<32x16xf32, #tpu.memory_space<vmem>>, %arg8: memref<1x16xf32, #tpu.memory_space<vmem>>, %arg9: memref<1x8x16xf32, #tpu.memory_space<vmem>>, %arg10: memref<1x8x16xf32, #tpu.memory_space<vmem>>, %arg11: memref<1x8x16xf32, #tpu.memory_space<vmem>>) attributes {dimension_semantics = [#tpu.dimension_semantics<parallel>, #tpu.dimension_semantics<parallel>], iteration_bounds = array<i64: 2, 1>, scalar_prefetch = 0 : i64, scratch_operands = 0 : i64, tpu.core_type = #tpu.core_type<tc>, window_params = [{transform_indices = @transform_0, window_bounds = array<i64: 1, 8, 32>}, {pipeline_mode = #tpu.pipeline_mode<synchronous>, transform_indices = @transform_1, window_bounds = array<i64: 32, 16>}, {pipeline_mode = #tpu.pipeline_mode<synchronous>, transform_indices = @transform_2, window_bounds = array<i64: 1, 16>}, {pipeline_mode = #tpu.pipeline_mode<synchronous>, transform_indices = @transform_3, window_bounds = array<i64: 32, 16>}, {pipeline_mode = #tpu.pipeline_mode<synchronous>, transform_indices = @transform_4, window_bounds = array<i64: 1, 16>}, {pipeline_mode = #tpu.pipeline_mode<synchronous>, transform_indices = @transform_5, window_bounds = array<i64: 32, 16>}, {pipeline_mode = #tpu.pipeline_mode<synchronous>, transform_indices = @transform_6, window_bounds = array<i64: 1, 16>}, {transform_indices = @transform_7, window_bounds = array<i64: 1, 8, 16>}, {transform_indices = @transform_8, window_bounds = array<i64: 1, 8, 16>}, {transform_indices = @transform_9, window_bounds = array<i64: 1, 8, 16>}]} {
    %c0 = arith.constant 0 : index
    %c0_0 = arith.constant 0 : index
    %c0_1 = arith.constant 0 : index
    %0 = vector.load %arg2[%c0, %c0_0, %c0_1] : memref<1x8x32xf32, #tpu.memory_space<vmem>>, vector<1x8x32xf32>
    %1 = vector.shape_cast %0 : vector<1x8x32xf32> to vector<8x32xf32>
    %c0_2 = arith.constant 0 : index
    %c0_3 = arith.constant 0 : index
    %2 = vector.load %arg3[%c0_2, %c0_3] : memref<32x16xf32, #tpu.memory_space<vmem>>, vector<32x16xf32>
    %cst = arith.constant dense<0.000000e+00> : vector<8x16xf32>
    %3 = tpu.matmul %1, %2, %cst {dimension_numbers = #tpu.dot_dimension_numbers<[1], [0], [0], [1], [0, 0, 1, 1], [], []>} : vector<8x32xf32>, vector<32x16xf32>, vector<8x16xf32> -> vector<8x16xf32>
    %c0_4 = arith.constant 0 : index
    %c0_5 = arith.constant 0 : index
    %4 = vector.load %arg4[%c0_4, %c0_5] : memref<1x16xf32, #tpu.memory_space<vmem>>, vector<1x16xf32>
    %5 = vector.broadcast %4 : vector<1x16xf32> to vector<8x16xf32>
    %6 = arith.addf %3, %5 : vector<8x16xf32>
    %cst_6 = arith.constant 2.500000e-01 : f32
    %7 = vector.broadcast %cst_6 : f32 to vector<8x16xf32>
    %8 = arith.mulf %6, %7 : vector<8x16xf32>
    %c0_7 = arith.constant 0 : index
    %c0_8 = arith.constant 0 : index
    %c0_9 = arith.constant 0 : index
    %9 = vector.load %arg9[%c0_7, %c0_8, %c0_9] : memref<1x8x16xf32, #tpu.memory_space<vmem>>, vector<1x8x16xf32>
    %10 = vector.shape_cast %9 : vector<1x8x16xf32> to vector<8x16xf32>
    %11 = vector.shape_cast %8 : vector<8x16xf32> to vector<1x8x16xf32>
    tpu.vector_store %arg9[%c0_7, %c0_8, %c0_9], %11 {strides = array<i32>} : memref<1x8x16xf32, #tpu.memory_space<vmem>>, vector<1x8x16xf32>,
    %c0_10 = arith.constant 0 : index
    %c0_11 = arith.constant 0 : index
    %12 = vector.load %arg5[%c0_10, %c0_11] : memref<32x16xf32, #tpu.memory_space<vmem>>, vector<32x16xf32>
    %cst_12 = arith.constant dense<0.000000e+00> : vector<8x16xf32>
    %13 = tpu.matmul %1, %12, %cst_12 {dimension_numbers = #tpu.dot_dimension_numbers<[1], [0], [0], [1], [0, 0, 1, 1], [], []>} : vector<8x32xf32>, vector<32x16xf32>, vector<8x16xf32> -> vector<8x16xf32>
    %c0_13 = arith.constant 0 : index
    %c0_14 = arith.constant 0 : index
    %14 = vector.load %arg6[%c0_13, %c0_14] : memref<1x16xf32, #tpu.memory_space<vmem>>, vector<1x16xf32>
    %15 = vector.broadcast %14 : vector<1x16xf32> to vector<8x16xf32>
    %16 = arith.addf %13, %15 : vector<8x16xf32>
    %c0_15 = arith.constant 0 : index
    %c0_16 = arith.constant 0 : index
    %c0_17 = arith.constant 0 : index
    %17 = vector.load %arg10[%c0_15, %c0_16, %c0_17] : memref<1x8x16xf32, #tpu.memory_space<vmem>>, vector<1x8x16xf32>
    %18 = vector.shape_cast %17 : vector<1x8x16xf32> to vector<8x16xf32>
    %19 = vector.shape_cast %16 : vector<8x16xf32> to vector<1x8x16xf32>
    tpu.vector_store %arg10[%c0_15, %c0_16, %c0_17], %19 {strides = array<i32>} : memref<1x8x16xf32, #tpu.memory_space<vmem>>, vector<1x8x16xf32>,
    %c0_18 = arith.constant 0 : index
    %c0_19 = arith.constant 0 : index
    %20 = vector.load %arg7[%c0_18, %c0_19] : memref<32x16xf32, #tpu.memory_space<vmem>>, vector<32x16xf32>
    %cst_20 = arith.constant dense<0.000000e+00> : vector<8x16xf32>
    %21 = tpu.matmul %1, %20, %cst_20 {dimension_numbers = #tpu.dot_dimension_numbers<[1], [0], [0], [1], [0, 0, 1, 1], [], []>} : vector<8x32xf32>, vector<32x16xf32>, vector<8x16xf32> -> vector<8x16xf32>
    %c0_21 = arith.constant 0 : index
    %c0_22 = arith.constant 0 : index
    %22 = vector.load %arg8[%c0_21, %c0_22] : memref<1x16xf32, #tpu.memory_space<vmem>>, vector<1x16xf32>
    %23 = vector.broadcast %22 : vector<1x16xf32> to vector<8x16xf32>
    %24 = arith.addf %21, %23 : vector<8x16xf32>
    %c0_23 = arith.constant 0 : index
    %c0_24 = arith.constant 0 : index
    %c0_25 = arith.constant 0 : index
    %25 = vector.load %arg11[%c0_23, %c0_24, %c0_25] : memref<1x8x16xf32, #tpu.memory_space<vmem>>, vector<1x8x16xf32>
    %26 = vector.shape_cast %25 : vector<1x8x16xf32> to vector<8x16xf32>
    %27 = vector.shape_cast %24 : vector<8x16xf32> to vector<1x8x16xf32>
    tpu.vector_store %arg11[%c0_23, %c0_24, %c0_25], %27 {strides = array<i32>} : memref<1x8x16xf32, #tpu.memory_space<vmem>>, vector<1x8x16xf32>,
    return
  }
  func.func @transform_0(%arg0: i32, %arg1: i32) -> (i32, i32, i32) {
    %c0_i32 = arith.constant 0 : i32
    %c0_i32_0 = arith.constant 0 : i32
    return %arg0, %arg1, %c0_i32 : i32, i32, i32
  }
  func.func @transform_1(%arg0: i32, %arg1: i32) -> (i32, i32) {
    %c0_i32 = arith.constant 0 : i32
    %c0_i32_0 = arith.constant 0 : i32
    %c0_i32_1 = arith.constant 0 : i32
    return %c0_i32, %c0_i32_0 : i32, i32
  }
  func.func @transform_2(%arg0: i32, %arg1: i32) -> (i32, i32) {
    %c0_i32 = arith.constant 0 : i32
    %c0_i32_0 = arith.constant 0 : i32
    %c0_i32_1 = arith.constant 0 : i32
    return %c0_i32, %c0_i32_0 : i32, i32
  }
  func.func @transform_3(%arg0: i32, %arg1: i32) -> (i32, i32) {
    %c0_i32 = arith.constant 0 : i32
    %c0_i32_0 = arith.constant 0 : i32
    %c0_i32_1 = arith.constant 0 : i32
    return %c0_i32, %c0_i32_0 : i32, i32
  }
  func.func @transform_4(%arg0: i32, %arg1: i32) -> (i32, i32) {
    %c0_i32 = arith.constant 0 : i32
    %c0_i32_0 = arith.constant 0 : i32
    %c0_i32_1 = arith.constant 0 : i32
    return %c0_i32, %c0_i32_0 : i32, i32
  }
  func.func @transform_5(%arg0: i32, %arg1: i32) -> (i32, i32) {
    %c0_i32 = arith.constant 0 : i32
    %c0_i32_0 = arith.constant 0 : i32
    %c0_i32_1 = arith.constant 0 : i32
    return %c0_i32, %c0_i32_0 : i32, i32
  }
  func.func @transform_6(%arg0: i32, %arg1: i32) -> (i32, i32) {
    %c0_i32 = arith.constant 0 : i32
    %c0_i32_0 = arith.constant 0 : i32
    %c0_i32_1 = arith.constant 0 : i32
    return %c0_i32, %c0_i32_0 : i32, i32
  }
  func.func @transform_7(%arg0: i32, %arg1: i32) -> (i32, i32, i32) {
    %c0_i32 = arith.constant 0 : i32
    %c0_i32_0 = arith.constant 0 : i32
    return %arg0, %arg1, %c0_i32 : i32, i32, i32
  }
  func.func @transform_8(%arg0: i32, %arg1: i32) -> (i32, i32, i32) {
    %c0_i32 = arith.constant 0 : i32
    %c0_i32_0 = arith.constant 0 : i32
    return %arg0, %arg1, %c0_i32 : i32, i32, i32
  }
  func.func @transform_9(%arg0: i32, %arg1: i32) -> (i32, i32, i32) {
    %c0_i32 = arith.constant 0 : i32
    %c0_i32_0 = arith.constant 0 : i32
    return %arg0, %arg1, %c0_i32 : i32, i32, i32
  }
}

</mosaic_0001>

<bundles_post_ra>
// kernel: tpu_custom_call.1
= control target key start
LH: loop header
LB: loop body
LE: loop exit
PB: predicated region body
PF: predicated region fallthrough
CT: control target
= control target key end

     0   :  { %s1381_s0 = inlined_call_operand.vmem [shape: f32[2,8,32], index: 0, kind: input, shape index: {}]   ;;  %s1382_s1 = inlined_call_operand.vmem [shape: f32[32,16], index: 1, kind: input, shape index: {}]   ;;  %s1383_s2 = inlined_call_operand.vmem [shape: f32[1,16], index: 2, kind: input, shape index: {}]   ;;  %s1384_s3 = inlined_call_operand.vmem [shape: f32[32,16], index: 3, kind: input, shape index: {}]   ;;  %s1385_s4 = inlined_call_operand.vmem [shape: f32[1,16], index: 4, kind: input, shape index: {}]   ;;  %s1386_s5 = inlined_call_operand.vmem [shape: f32[32,16], index: 5, kind: input, shape index: {}]   ;;  %s1387_s6 = inlined_call_operand.vmem [shape: f32[1,16], index: 6, kind: input, shape index: {}]   ;;  %s1388_s7 = inlined_call_operand.hbm [shape: f32[2,8,16], index: 7, kind: output, shape index: {0}]   ;;  %s1389_s8 = inlined_call_operand.hbm [shape: f32[2,8,16], index: 8, kind: output, shape index: {1}]   ;;  %s1390_s9 = inlined_call_operand.hbm [shape: f32[2,8,16], index: 9, kind: output, shape index: {2}]  }
   0x1   :  { %1393 = sst [smem:[#allocation9_spill]] %s1381_s0 }
   0x2   :  { %1394 = sst [smem:[#allocation10_spill]] %s1382_s1 }
   0x3   :  { %1395 = sst [smem:[#allocation11_spill]] %s1383_s2 }
   0x4   :  { %1396 = sst [smem:[#allocation12_spill]] %s1384_s3 }
   0x5   :  { %1397 = sst [smem:[#allocation13_spill]] %s1385_s4 }
   0x6   :  { %1398 = sst [smem:[#allocation14_spill]] %s1386_s5 }
   0x7   :  { %15 = vsyncpa [#allocation3], 0 }
   0x8   :  { %17 = vsyncpa [#allocation3 + $0x1], 0 }
   0x9   :  { %18 = vsyncpa [#allocation5], 0 }
   0xa   :  { %20 = vsyncpa [#allocation5 + $0x1], 0  ;;  %s1142_s30 = smov 0   ;;  %s1144_s10 = smov 0  }
   0xb   :  { %s1146_s11 = smov 0   ;;  %s1148_s12 = smov 0  }
   0xc   :  { %s1150_s13 = smov 0   ;;  %s1152_s14 = smov 0  }
   0xd LB: > { %s815_s15 = sadd.s32 4294967295, %s1085_s14   ;;  %s1391_s16 = sadd.s32 4294967294, %s1085_s14   ;;  %s1085_s14 = sphi %s1152_s14, %s26_s14   ;;  %s1081_s13 = sphi %s1150_s13, %s1413_s13   ;;  %s1077_s12 = sphi %s1148_s12, %s1412_s12   ;;  %s1073_s11 = sphi %s1146_s11, %s1411_s11   ;;  %s1069_s10 = sphi %s1144_s10, %s1410_s10   ;;  %s1065_s30 = sphi %s1142_s30, %s1409_s30  }
   0xe   : > { %s38_s17 = sadd.s32 1, %s1081_s13  ;;  %s201_s18 = sadd.s32 1, %s1073_s11 }
   0xf   : > { %p40_p0 = scmp.ge.s32.totalorder %s38_s17, 2  ;;  %p211_p1 = scmp.ne.s32.totalorder %s1073_s11, %s1069_s10 }
  0x10   : > { %p212_p2 = scmp.eq.s32.totalorder %s815_s15, 1  ;;  %p217_p3 = scmp.ne.s32.totalorder %s1069_s10, %s1065_s30 }
  0x11   : > { %s1415_s17 = smov (%p40_p0, %s38_s17), 0  ;;  %p218_p5 = scmp.eq.s32.totalorder %s1391_s16, 1 }
  0x12   : > { %p1184_p4 = por %p212_p2, %p211_p1  ;;  %s196_s20 = ssub.s32 %s1081_s13, %s1415_s17 }
  0x13   : > { %p819_p6 = scmp.ge.s32.totalorder %s1085_s14, 1  ;;  %p199_p7 = scmp.eq.s32.totalorder %s196_s20, 0 }
  0x14   : > { %p1193_p8 = por %p218_p5, %p217_p3  ;;  %p320_p9 = scmp.lt.s32.totalorder %s1085_s14, 3 }
  0x15   : > { %s1199_s22 = scalar_select %p199_p7, %s1073_s11, %s201_s18  }
  0x16   : > { %p321_p10 = pnand %p819_p6, %p320_p9 }
  0x17   : > { %s1401_s1 = sld [smem:[#allocation10_spill]] (!%p321_p10)  ;;  %p368_p11 = scmp.lt.s32.totalorder (!%p321_p10), %s1077_s12, 1 }
  0x18   : > { %324 = sbr.rel (%p321_p10) target bundleno = 298 (0x12a), region = 48  ;;  %s1402_s3 = sld [smem:[#allocation12_spill]] (!%p321_p10) }
  0x19   : > { %s1403_s0 = sld [smem:[#allocation9_spill]] (!%p321_p10)  ;;  %s1256_s16 = sand.u32 (!%p321_p10), 1, %s815_s15  }
  0x1a   : > { %s1404_s5 = sld [smem:[#allocation14_spill]] (!%p321_p10) }
  0x1b   : > { %s1405_s2 = sld [smem:[#allocation11_spill]] (!%p321_p10) }
  0x1c   : > { %s1406_s4 = sld [smem:[#allocation13_spill]] (!%p321_p10) }
  0x1d   : > { %v379_v0 = vld [vmem:[%s1401_s1 + $0x18] sm:$0xff]  ;;  %v1087_v1 = vmov 0.0   ;;  %v378_v2 = vld [vmem:[%s1401_s1 + $0x10] sm:$0xff]  ;;  %s369_s29 = scalar_select %p368_p11, %s1077_s12, 1  ;;  %v377_v5 = vld [vmem:[%s1401_s1 + $0x8] sm:$0xff]  ;;  %vm1088_vm0 = vmmov 0  }
  0x1e   : > { %853 = vmatprep.subr.mxu0 %v1087_v1  ;;  %864 = vmatprep.subr.mxu1 %v1087_v1  ;;  %v467_v3 = vld [vmem:[%s1402_s3 + $0x18] sm:$0xff]  ;;  %v466_v4 = vld [vmem:[%s1402_s3 + $0x10] sm:$0xff]  ;;  %v465_v6 = vld [vmem:[%s1402_s3 + $0x8] sm:$0xff]  ;;  %vm387_vm1 = vcmask 261120   ;;  %vm462_vm2 = vcmask 130048  }
  0x1f   : > { %854 = vmatpush3.msra.mxu0 %v379_v0  ;;  %865 = vmatpush3.msra.mxu1 %v467_v3  ;;  %s823_s25 = sshll.u32 %s369_s29, 3  ;;  %v376_v7 = vld [vmem:[%s1401_s1] sm:$0xff]  ;;  %s351_s29 = sand.u32 1, %s1069_s10  }
  0x20   : > { %855 = vmatprep.subr.mxu0 %v1087_v1  ;;  %861 = vmatprep.mubr.msk.f32.mxu0 %vm1088_vm0, %v1087_v1  ;;  %s374_s23 = scalar_lea.vmem %s1403_s0, %s823_s25  ;;  %v549_v9 = vld [vmem:[%s1404_s5 + $0x18] sm:$0xff]  ;;  %v464_v10 = vld [vmem:[%s1402_s3] sm:$0xff]  ;;  %v548_v11 = vld [vmem:[%s1404_s5 + $0x10] sm:$0xff]  ;;  %s1249_s24 = sshll.u32 %s351_s29, 3 }
  0x21   : > { %856 = vmatpush3.msra.mxu0 %v378_v2  ;;  %866 = vmatprep.subr.mxu1 %v1087_v1  ;;  %v375_v8 = vld [vmem:[%s374_s23] sm:$0xff]  ;;  %v547_v12 = vld [vmem:[%s1404_s5 + $0x8] sm:$0xff]  ;;  %s1259_s25 = sshll.u32 %s1077_s12, 7  ;;  %s353_s28 = scalar_lea.vmem [#allocation2], %s1249_s24 }
  0x22   : > { %857 = vmatprep.subr.mxu0 %v1087_v1  ;;  %867 = vmatpush3.msra.mxu1 %v466_v4  ;;  %v546_v13 = vld [vmem:[%s1404_s5] sm:$0xff]  ;;  %s653_s18 = sshll.u32 %s353_s28, 4  ;;  %s360_s26 = scalar_lea.vmem [#allocation4], %s1249_s24  ;;  %s1272_s18 = int_to_ptr.vmem [resolvable:$true] %s653_s18 }
  0x23   : > { %858 = vmatpush3.msra.mxu0 %v377_v5  ;;  %868 = vmatprep.subr.mxu1 %v1087_v1  ;;  %v824_v14 = vld [vmem:[%s1405_s2] ss:$0 sm:$0xff]  ;;  %s667_s27 = sshll.u32 %s360_s26, 4  ;;  %s1270_s0 = scalar_lea.hbm %s1388_s7, %s1259_s25  ;;  %s1280_s27 = int_to_ptr.vmem [resolvable:$true] %s667_s27 }
  0x24   : > { %859 = vmatprep.subr.mxu0 %v1087_v1  ;;  %869 = vmatpush3.msra.mxu1 %v465_v6  ;;  %v826_v17 = vld [vmem:[%s1406_s4] ss:$0 sm:$0xff]  ;;  %s1278_s1 = scalar_lea.hbm %s1389_s8, %s1259_s25  ;;  %s1392_s2 = scalar_lea.vmem [#allocation6], %s1249_s24 }
  0x25   : > { %860 = vmatpush3.msra.mxu0 %v376_v7  ;;  %870 = vmatprep.subr.mxu1 %v1087_v1  ;;  %s1286_s12 = sshll.u32 %s1392_s2, 4  ;;  %v828_v23 = vld [vmem:[%s1387_s6] ss:$0 sm:$0xff]  ;;  %s629_s4 = scalar_lea.sflag [#allocation3], %s351_s29  ;;  %s682_s12 = int_to_ptr.vmem [resolvable:$true] %s1286_s12 }
  0x26   : > { %862 = vmatmul.mubr.msk.f32.vlgmr.msra.gmra.mxu0 %vm387_vm1, %v375_v8  ;;  %875 = vmatprep.subr.mxu0 %v1087_v1  ;;  %s953_s20 = scalar_lea.vmem %s1272_s18, 128  ;;  %s1089_s23 = smov [#allocation2]  }
  0x27   : > { %876 = vmatpush3.msra.mxu0 %v549_v9  ;;  %871 = vmatpush3.msra.mxu1 %v464_v10  ;;  %p954_p12 = scmp.ne.s32.totalorder %s1272_s18, %s953_s20  ;;  %s957_s5 = sshll.u32 %s1089_s23, 4  ;;  %s958_s5 = int_to_ptr.vmem [resolvable:$false] %s957_s5 }
  0x28   : > { %877 = vmatprep.subr.mxu0 %v1087_v1  ;;  %872 = vmatprep.mubr.msk.f32.mxu1 %vm1088_vm0, %v1087_v1  ;;  %p960_p1 = scmp.lt.s32.totalorder %s1272_s18, %s958_s5 }
  0x29   : > { %878 = vmatpush3.msra.mxu0 %v548_v11  ;;  %873 = vmatmul.mubr.msk.f32.vlgmr.msra.gmra.mxu1 %vm387_vm1, %v375_v8  ;;  %p955_p13 = pnand %p954_p12, %p1184_p4 }
  0x2a   : > { %879 = vmatprep.subr.mxu0 %v1087_v1  ;;  %883 = vmatprep.mubr.msk.f32.mxu0 %vm1088_vm0, %v1087_v1 }
  0x2b   : > { %880 = vmatpush3.msra.mxu0 %v547_v12  ;;  %p956_p0 = pneg %p955_p13 }
  0x2c   : > { %881 = vmatprep.subr.mxu0 %v1087_v1 }
  0x2d   : > { %882 = vmatpush3.msra.mxu0 %v546_v13 }
  0x2e   : > { %884 = vmatmul.mubr.msk.f32.vlgmr.msra.gmra.mxu0 %vm387_vm1, %v375_v8 }
  0xe6   : > { %v457_v15 = vpop.f32.mrf.mxu0 }
  0xe7   : > { %v458_v16 = vadd.f32 %v824_v14, %v457_v15 }
  0xe8   : > { %v863_v18 = vpop.f32.mrf.mxu0 }
  0xe9   : > { %v461_v19 = vmul.f32 0.25, %v458_v16  ;;  %v541_v20 = vpop.f32.mrf.mxu1 }
  0xea   : > { %v542_v21 = vadd.f32 %v826_v17, %v541_v20 }
  0xeb   : > { %v874_v22 = vpop.f32.mrf.mxu1  ;;  %463 = vst.msk [vmem:[%s353_s28] sm:$0xff] %vm462_vm2, %v461_v19  ;;  %s959_s28 = scalar_lea.vmem %s958_s5, 256 }
  0xec   : > { %545 = vst.msk [vmem:[%s360_s26] sm:$0xff] %vm462_vm2, %v542_v21  ;;  %p961_p2 = scmp.lt.s32.totalorder %s959_s28, %s953_s20 }
  0xee   : > { %p962_p3 = por %p961_p2, %p960_p1 }
  0xf0   : > { %p963_p5 = pnand %p962_p3, %p956_p0 }
  0xf2   : > { %966 = shalt.err (!%p963_p5)
}
  0xf3   : > { %s967_s3 = scalar_lea.hbm %s1270_s0, 128  ;;  %s971_s15 = scalar_lea.hbm %s1388_s7, 256 }
  0xf4   : > { %p968_p6 = scmp.ne.s32.totalorder %s1270_s0, %s967_s3  ;;  %p972_p10 = scmp.lt.s32.totalorder %s1270_s0, %s1388_s7 }
  0xf5   : > { %p973_p11 = scmp.lt.s32.totalorder %s971_s15, %s967_s3 }
  0xf6   : > { %p969_p7 = pnand %p968_p6, %p1184_p4 }
  0xf7   : > { %p974_p12 = por %p973_p11, %p972_p10 }
  0xf8   : > { %p970_p9 = pneg %p969_p7 }
  0xfa   : > { %p975_p13 = pnand %p974_p12, %p970_p9 }
  0xfc   : > { %978 = shalt.err (!%p975_p13)
}
  0xfd   : > { %886 = dma.vmem_to_hbm [thread:$0]  (%p1184_p4), %s1272_s18, 128, %s1270_s0, %s629_s4  }
  0xfe   : > { %s634_s5 = scalar_lea.sflag [#allocation5], %s1256_s16  ;;  %s979_s20 = scalar_lea.vmem %s1280_s27, 128 }
  0xff   : > { %p980_p0 = scmp.ne.s32.totalorder %s1280_s27, %s979_s20  ;;  %s1090_s2 = smov [#allocation4]  }
 0x100   : > { %s983_s28 = sshll.u32 %s1090_s2, 4  ;;  %s984_s28 = int_to_ptr.vmem [resolvable:$false] %s983_s28 }
 0x101   : > { %p981_p1 = pnand %p980_p0, %p1184_p4  ;;  %s985_s3 = scalar_lea.vmem %s984_s28, 256 }
 0x102   : > { %p986_p3 = scmp.lt.s32.totalorder %s1280_s27, %s984_s28  ;;  %p987_p5 = scmp.lt.s32.totalorder %s985_s3, %s979_s20 }
 0x103   : > { %p982_p2 = pneg %p981_p1 }
 0x104   : > { %p988_p6 = por %p987_p5, %p986_p3 }
 0x106   : > { %p989_p7 = pnand %p988_p6, %p982_p2 }
 0x108   : > { %992 = shalt.err (!%p989_p7)
}
 0x109   : > { %s993_s0 = scalar_lea.hbm %s1278_s1, 128  ;;  %s997_s29 = scalar_lea.hbm %s1389_s8, 256 }
 0x10a   : > { %p994_p9 = scmp.ne.s32.totalorder %s1278_s1, %s993_s0  ;;  %p998_p12 = scmp.lt.s32.totalorder %s1278_s1, %s1389_s8 }
 0x10b   : > { %p999_p13 = scmp.lt.s32.totalorder %s997_s29, %s993_s0 }
 0x10c   : > { %p995_p10 = pnand %p994_p9, %p1184_p4 }
 0x10d   : > { %p1000_p0 = por %p999_p13, %p998_p12 }
 0x10e   : > { %p996_p11 = pneg %p995_p10 }
 0x110   : > { %p1001_p1 = pnand %p1000_p0, %p996_p11 }
 0x112   : > { %1004 = shalt.err (!%p1001_p1)
}
 0x113   : > { %887 = dma.vmem_to_hbm [thread:$0]  (%p1184_p4), %s1280_s27, 128, %s1278_s1, %s634_s5   ;;  %v623_v24 = vpop.f32.mrf.mxu0 }
 0x114   : > { %v624_v25 = vadd.f32 %v828_v23, %v623_v24  ;;  %s679_s2 = scalar_lea.hbm %s1390_s9, %s1259_s25  ;;  %s1407_s28 = scalar_lea.vmem [#allocation6], %s1249_s24 }
 0x115   : > { %v885_v26 = vpop.f32.mrf.mxu0  ;;  %s1005_s3 = scalar_lea.vmem %s682_s12, 128  ;;  %s1091_s0 = smov [#allocation6]  }
 0x116   : > { %627 = vst.msk [vmem:[%s1407_s28] sm:$0xff] %vm462_vm2, %v624_v25  ;;  %p1006_p2 = scmp.ne.s32.totalorder %s682_s12, %s1005_s3  ;;  %s1009_s4 = sshll.u32 %s1091_s0, 4  ;;  %s1010_s4 = int_to_ptr.vmem [resolvable:$false] %s1009_s4 }
 0x117   : > { %s1011_s1 = scalar_lea.vmem %s1010_s4, 256  ;;  %p1012_p6 = scmp.lt.s32.totalorder %s682_s12, %s1010_s4 }
 0x118   : > { %p1007_p3 = pnand %p1006_p2, %p1184_p4  ;;  %p1013_p7 = scmp.lt.s32.totalorder %s1011_s1, %s1005_s3 }
 0x11a   : > { %p1008_p5 = pneg %p1007_p3  ;;  %p1014_p9 = por %p1013_p7, %p1012_p6 }
 0x11c   : > { %p1015_p10 = pnand %p1014_p9, %p1008_p5 }
 0x11e   : > { %1018 = shalt.err (!%p1015_p10)
}
 0x11f   : > { %s1019_s25 = scalar_lea.hbm %s679_s2, 128  ;;  %s1023_s18 = scalar_lea.hbm %s1390_s9, 256 }
 0x120   : > { %p1020_p11 = scmp.ne.s32.totalorder %s679_s2, %s1019_s25  ;;  %p1024_p0 = scmp.lt.s32.totalorder %s679_s2, %s1390_s9 }
 0x121   : > { %p1025_p1 = scmp.lt.s32.totalorder %s1023_s18, %s1019_s25 }
 0x122   : > { %p1021_p12 = pnand %p1020_p11, %p1184_p4 }
 0x123   : > { %p1026_p2 = por %p1025_p1, %p1024_p0 }
 0x124   : > { %p1022_p13 = pneg %p1021_p12 }
 0x126   : > { %p1027_p3 = pnand %p1026_p2, %p1022_p13 }
 0x128   : > { %1030 = shalt.err (!%p1027_p3)
}
 0x129   : > { %888 = dma.vmem_to_hbm [thread:$0]  (%p1184_p4), %s682_s12, 128, %s679_s2, %s634_s5  }
 0x12a PF: > { %p902_p5 = scmp.ge.s32.totalorder %s1085_s14, 2  ;;  %s693_s15 = sand.u32 1, %s1065_s30  }
 0x12b   : > { %s694_s23 = scalar_lea.sflag [#allocation3], %s693_s15 }
 0x12c   : > { %p893_p6 = pnand %p902_p5, %p1193_p8 }
 0x12e   : > { %p894_p7 = pneg %p893_p6 }
 0x130   : > { %1056 = dma.done.wait (%p894_p7), %s694_s23, 128  }
 0x131   : > { %1058 = vsyncadd (%p894_p7), %s694_s23, 4294967168  ;;  %s1408_s20 = sadd.s32 4294967294, %s1085_s14  }
 0x132   : > { %s702_s28 = sand.u32 1, %s1408_s20  }
 0x133   : > { %s703_s3 = scalar_lea.sflag [#allocation5], %s702_s28 }
 0x134   : > { %1060 = dma.done.wait (%p894_p7), %s703_s3, 256  }
 0x135   : > { %1062 = vsyncadd (%p894_p7), %s703_s3, 4294967040  ;;  %s26_s14 = sadd.s32 1, %s1085_s14   ;;  %s1409_s30 = smov %s1069_s10 }
 0x136   : > { %p23_p4 = scmp.ge.s32.totalorder %s26_s14, 4   ;;  %s1410_s10 = smov %s1073_s11 }
 0x137   : > { %s1411_s11 = smov %s1199_s22  ;;  %s1412_s12 = smov %s1081_s13 }
 0x138   : > { %s1413_s13 = smov %s1415_s17  ;;  %25 = sbr.rel (!%p23_p4) target bundleno = 13 (0xd), region = 115 }
 0x13d   :  { %717 = vsyncpa [#allocation3], 1 }
 0x13e   :  { %719 = vsyncpa [#allocation3 + $0x1], 1 }
 0x13f   :  { %720 = vsyncpa [#allocation5], 1 }
 0x140   :  { %722 = vsyncpa [#allocation5 + $0x1], 1 }

</bundles_post_ra>
